<compile_context>
chip_gen: v6e
topology: v6e:2x2x1
jax: 0.10.0
libtpu: 0.0.40
codegen_flags: <defaults>
</compile_context>

<pallas_src>
import jax
import jax.numpy as jnp
from jax import lax
from jax.experimental import pallas as pl
from jax.experimental.pallas import tpu as pltpu

# ---------------------------------------------------------------------------
# Problem sizes (small, consistent with the module's forward).
# ---------------------------------------------------------------------------
N = 1              # torch.cat((f, x2.unsqueeze(0)), dim=1) requires batch == 1
C_IN = 4
H = 16
W = 16             # power of two -> row/col from shift & mask (no int div)
HW = H * W
C_OUT = 32         # fe output channels
E = 8              # length of the auxiliary numpy feature vector x2
NUM_CLASSES = 5
KH = KW = 3
KK = KH * KW

assert (W & (W - 1)) == 0, "W must be a power of two for the shift/mask trick"
_W_SHIFT = int(W).bit_length() - 1

# Packed parameter slab layout (rows x 128 lanes, f32, built once):
#   slab[0:32,   0:36]  conv weight, tap-major / channel-minor   (C_OUT, KK*C_IN)
#   slab[0:32,  40   ]  conv bias column                          (C_OUT, 1)
#   slab[0:40,  64:69]  classifier weight [w1 * 1/(H*W) ; w2]     (C_OUT+E, NUM_CLASSES)
#   slab[40,    64:69]  classifier bias                           (1, NUM_CLASSES)
SLAB_ROWS = 48
SLAB_LANES = 128
BC_LANE = 40
WCAT_LANE = 64


# ---------------------------------------------------------------------------
# Fused kernel: conv3x3(pad=1) + bias + ReLU + GAP + linear head
# ---------------------------------------------------------------------------
def _fused_kernel(x_ref, x2_ref, p_ref, out_ref):
    # x_ref  : (C_IN, HW)            flattened CHW image (row-major spatial)
    # x2_ref : (E, 1)                auxiliary feature vector (column)
    # p_ref  : (SLAB_ROWS, 128)      packed parameter slab (see layout above)
    # out_ref: (1, NUM_CLASSES)
    x = x_ref[...]                                           # (C_IN, HW) f32

    # Pixel coordinates of each flattened spatial position (computed once).
    pix = lax.broadcasted_iota(jnp.int32, (C_IN, HW), 1)
    row = pix >> _W_SHIFT                                    # pix // W
    col = pix & (W - 1)                                      # pix %  W

    # Hoisted SAME-padding edge masks: one per non-zero row/col offset.
    m_row = {-1: row >= 1, 0: None, 1: row < (H - 1)}
    m_col = {-1: col >= 1, 0: None, 1: col < (W - 1)}

    # im2col built fully in vregs: 9 shifted + boundary-masked copies of the
    # flattened image stacked along the contraction axis (no VMEM scratch,
    # no jnp.pad anywhere).
    taps = []
    for kh in range(KH):
        for kw in range(KW):
            dr, dc = kh - 1, kw - 1
            d = dr * W + dc                                  # flat source offset
            # shifted[c, p] == x[c, p + d]   (wrap garbage masked below)
            src = x if d == 0 else pltpu.roll(x, shift=(-d) % HW, axis=1)
            rm, cm = m_row[dr], m_col[dc]
            if rm is None and cm is None:
                tap = src
            else:
                valid = rm if cm is None else (cm if rm is None else rm & cm)
                tap = jnp.where(valid, src, 0.0)             # f32 select (v5e-safe)
            taps.append(tap)
    patch = jnp.concatenate(taps, axis=0)                    # (KK*C_IN, HW) = (36, 256)

    # Single K=36 MXU contraction -> lane-dense (C_OUT, HW) = (32, 256) f32 acc.
    # bf16 operands (single MXU pass on v6e/v7x), f32 accumulation.
    wc = p_ref[0:C_OUT, 0:KK * C_IN]                         # (32, 36)
    bc = p_ref[0:C_OUT, BC_LANE:BC_LANE + 1]                 # (32, 1)
    acc = jnp.dot(wc.astype(jnp.bfloat16), patch.astype(jnp.bfloat16),
                  preferred_element_type=jnp.float32)        # (C_OUT, HW)
    act = jnp.maximum(acc + bc, 0.0)                         # bias + ReLU
    pooled = jnp.sum(act, axis=1, keepdims=True)             # (C_OUT, 1) lane reduce
    # NOTE: the 1/(H*W) average-pool scale is folded into the classifier slab.

    # Classifier: concat [pooled ; x2] in-register, one broadcast-multiply +
    # sublane reduce against the packed (C_OUT+E, NUM_CLASSES) weight.
    feat = jnp.concatenate([pooled, x2_ref[...]], axis=0)    # (C_OUT+E, 1)
    wcat = p_ref[0:C_OUT + E, WCAT_LANE:WCAT_LANE + NUM_CLASSES]          # (40, 5)
    bl = p_ref[C_OUT + E:C_OUT + E + 1, WCAT_LANE:WCAT_LANE + NUM_CLASSES]  # (1, 5)
    out_ref[...] = jnp.sum(feat * wcat, axis=0, keepdims=True) + bl


def _fused_call(x_flat, x2_col, slab):
    vmem = pltpu.MemorySpace.VMEM
    return pl.pallas_call(
        _fused_kernel,
        out_shape=jax.ShapeDtypeStruct((1, NUM_CLASSES), jnp.float32),
        in_specs=[pl.BlockSpec(memory_space=vmem)] * 3,
        out_specs=pl.BlockSpec(memory_space=vmem),
        # Grid-less single invocation (N == 1); total live footprint << VMEM
        # on all of v5e/v6e/v7x.
        # TODO(synk): if batching is ever added, put images on a leading grid
        # axis with dimension_semantics=("parallel",) so v7x's second
        # TensorCore participates, and retile so the lane axis carries >=512
        # spatial positions per MXU call if the extractor grows.
    )(x_flat, x2_col, slab)


# ---------------------------------------------------------------------------
# One-time parameter packing (hoisted out of the per-forward path)
# ---------------------------------------------------------------------------
def prepare_params(params):
    conv_w_oihw, conv_b, lin_w_oi, lin_b = params
    # Conv weight OIHW -> (C_OUT, 9*C_IN), tap-major / channel-minor (matches
    # the im2col row order built in the kernel).
    wc = jnp.transpose(conv_w_oihw, (0, 2, 3, 1)).reshape(C_OUT, KK * C_IN)
    # Split the classifier weight (removes torch.cat) and fold the 1/(H*W)
    # pooling scale into the image half; stack as [w1 ; w2].
    w1 = lin_w_oi[:, :C_OUT].T * (1.0 / HW)                  # (C_OUT, NUM_CLASSES)
    w2 = lin_w_oi[:, C_OUT:].T                               # (E, NUM_CLASSES)

    slab = jnp.zeros((SLAB_ROWS, SLAB_LANES), jnp.float32)
    slab = slab.at[0:C_OUT, 0:KK * C_IN].set(wc.astype(jnp.float32))
    slab = slab.at[0:C_OUT, BC_LANE].set(conv_b.astype(jnp.float32))
    slab = slab.at[0:C_OUT, WCAT_LANE:WCAT_LANE + NUM_CLASSES].set(
        w1.astype(jnp.float32))
    slab = slab.at[C_OUT:C_OUT + E, WCAT_LANE:WCAT_LANE + NUM_CLASSES].set(
        w2.astype(jnp.float32))
    slab = slab.at[C_OUT + E, WCAT_LANE:WCAT_LANE + NUM_CLASSES].set(
        lin_b.astype(jnp.float32))
    return slab


@jax.jit
def multi_image_forward(x1_nchw, x2, slab):
    """x1_nchw: (1, C_IN, H, W) image; x2: (E,) auxiliary feature vector."""
    # NCHW with N == 1 -> (C_IN, H*W): a free reshape (no transpose, no pad).
    x_flat = x1_nchw.astype(jnp.float32).reshape(C_IN, HW)
    x2_col = x2.astype(jnp.float32).reshape(E, 1)            # unsqueeze, column
    return _fused_call(x_flat, x2_col, slab)


# ---------------------------------------------------------------------------
# Pure-JAX reference for validation
# ---------------------------------------------------------------------------
def reference(x1_nchw, x2, params):
    conv_w_oihw, conv_b, lin_w_oi, lin_b = params
    y = jax.lax.conv_general_dilated(
        x1_nchw.astype(jnp.float32), conv_w_oihw, (1, 1), "SAME",
        dimension_numbers=("NCHW", "OIHW", "NCHW"))
    y = jax.nn.relu(y + conv_b[None, :, None, None])
    f = jnp.mean(y, axis=(2, 3))                                       # (1, C_OUT)
    f = jnp.concatenate([f, x2.astype(jnp.float32)[None, :]], axis=1)  # (1, C_OUT+E)
    return f @ lin_w_oi.T + lin_b[None, :]


if __name__ == "__main__":
    key = jax.random.PRNGKey(0)
    k_x1, k_x2, k_cw, k_cb, k_lw, k_lb = jax.random.split(key, 6)

    # Inputs: x1 is the image (NCHW); x2 is the auxiliary numpy-like vector.
    x1 = jax.random.normal(k_x1, (N, C_IN, H, W), jnp.float32)
    x2 = jax.random.normal(k_x2, (E,), jnp.float32)

    # Deterministic synthetic parameters (shapes follow the PyTorch modules).
    conv_w = 0.1 * jax.random.normal(k_cw, (C_OUT, C_IN, KH, KW), jnp.float32)  # OIHW
    conv_b = 0.1 * jax.random.normal(k_cb, (C_OUT,), jnp.float32)
    lin_w = 0.1 * jax.random.normal(k_lw, (NUM_CLASSES, C_OUT + E), jnp.float32)  # (out, in)
    lin_b = 0.1 * jax.random.normal(k_lb, (NUM_CLASSES,), jnp.float32)
    params = (conv_w, conv_b, lin_w, lin_b)

    slab = prepare_params(params)        # one-time layout prep / packing

    out = jax.block_until_ready(multi_image_forward(x1, x2, slab))
    ref = jax.block_until_ready(reference(x1, x2, params))

    assert out.shape == (N, NUM_CLASSES), out.shape
    # bf16 MXU operands (f32 accumulation) -> slightly looser tolerance than
    # the previous all-f32 path.
    assert jnp.allclose(out, ref, atol=1e-2, rtol=1e-2), (out, ref)
    print("KERNEL_OK")
</pallas_src>

<mosaic_0001>
module attributes {stable_mosaic.version = 11 : i64} {
  func.func @_fused_kernel(%arg0: memref<4x256xf32, #tpu.memory_space<vmem>>, %arg1: memref<8x1xf32, #tpu.memory_space<vmem>>, %arg2: memref<48x128xf32, #tpu.memory_space<vmem>>, %arg3: memref<1x5xf32, #tpu.memory_space<vmem>>) attributes {dimension_semantics = [], scalar_prefetch = 0 : i64, scratch_operands = 0 : i64, tpu.core_type = #tpu.core_type<tc>} {
    %c0 = arith.constant 0 : index
    %c0_0 = arith.constant 0 : index
    %0 = vector.load %arg0[%c0, %c0_0] : memref<4x256xf32, #tpu.memory_space<vmem>>, vector<4x256xf32>
    %1 = tpu.iota {dimensions = array<i32: 1>} : vector<4x256xi32>
    %c4_i32 = arith.constant 4 : i32
    %2 = vector.broadcast %c4_i32 : i32 to vector<4x256xi32>
    %3 = arith.shrsi %1, %2 : vector<4x256xi32>
    %c15_i32 = arith.constant 15 : i32
    %4 = vector.broadcast %c15_i32 : i32 to vector<4x256xi32>
    %5 = arith.andi %1, %4 : vector<4x256xi32>
    %c1_i32 = arith.constant 1 : i32
    %6 = vector.broadcast %c1_i32 : i32 to vector<4x256xi32>
    %7 = arith.cmpi sge, %3, %6 : vector<4x256xi32>
    %c15_i32_1 = arith.constant 15 : i32
    %8 = vector.broadcast %c15_i32_1 : i32 to vector<4x256xi32>
    %9 = arith.cmpi slt, %3, %8 : vector<4x256xi32>
    %c1_i32_2 = arith.constant 1 : i32
    %10 = vector.broadcast %c1_i32_2 : i32 to vector<4x256xi32>
    %11 = arith.cmpi sge, %5, %10 : vector<4x256xi32>
    %c15_i32_3 = arith.constant 15 : i32
    %12 = vector.broadcast %c15_i32_3 : i32 to vector<4x256xi32>
    %13 = arith.cmpi slt, %5, %12 : vector<4x256xi32>
    %c17_i32 = arith.constant 17 : i32
    %14 = tpu.dynamic_rotate %0 by %c17_i32 dim 1 : vector<4x256xf32>, i32 -> vector<4x256xf32>
    %15 = arith.andi %7, %11 : vector<4x256xi1>
    %cst = arith.constant 0.000000e+00 : f32
    %16 = vector.broadcast %cst : f32 to vector<4x256xf32>
    %17 = arith.select %15, %14, %16 : vector<4x256xi1>, vector<4x256xf32>
    %c16_i32 = arith.constant 16 : i32
    %18 = tpu.dynamic_rotate %0 by %c16_i32 dim 1 : vector<4x256xf32>, i32 -> vector<4x256xf32>
    %cst_4 = arith.constant 0.000000e+00 : f32
    %19 = vector.broadcast %cst_4 : f32 to vector<4x256xf32>
    %20 = arith.select %7, %18, %19 : vector<4x256xi1>, vector<4x256xf32>
    %c15_i32_5 = arith.constant 15 : i32
    %21 = tpu.dynamic_rotate %0 by %c15_i32_5 dim 1 : vector<4x256xf32>, i32 -> vector<4x256xf32>
    %22 = arith.andi %7, %13 : vector<4x256xi1>
    %cst_6 = arith.constant 0.000000e+00 : f32
    %23 = vector.broadcast %cst_6 : f32 to vector<4x256xf32>
    %24 = arith.select %22, %21, %23 : vector<4x256xi1>, vector<4x256xf32>
    %c1_i32_7 = arith.constant 1 : i32
    %25 = tpu.dynamic_rotate %0 by %c1_i32_7 dim 1 : vector<4x256xf32>, i32 -> vector<4x256xf32>
    %cst_8 = arith.constant 0.000000e+00 : f32
    %26 = vector.broadcast %cst_8 : f32 to vector<4x256xf32>
    %27 = arith.select %11, %25, %26 : vector<4x256xi1>, vector<4x256xf32>
    %c255_i32 = arith.constant 255 : i32
    %28 = tpu.dynamic_rotate %0 by %c255_i32 dim 1 : vector<4x256xf32>, i32 -> vector<4x256xf32>
    %cst_9 = arith.constant 0.000000e+00 : f32
    %29 = vector.broadcast %cst_9 : f32 to vector<4x256xf32>
    %30 = arith.select %13, %28, %29 : vector<4x256xi1>, vector<4x256xf32>
    %c241_i32 = arith.constant 241 : i32
    %31 = tpu.dynamic_rotate %0 by %c241_i32 dim 1 : vector<4x256xf32>, i32 -> vector<4x256xf32>
    %32 = arith.andi %9, %11 : vector<4x256xi1>
    %cst_10 = arith.constant 0.000000e+00 : f32
    %33 = vector.broadcast %cst_10 : f32 to vector<4x256xf32>
    %34 = arith.select %32, %31, %33 : vector<4x256xi1>, vector<4x256xf32>
    %c240_i32 = arith.constant 240 : i32
    %35 = tpu.dynamic_rotate %0 by %c240_i32 dim 1 : vector<4x256xf32>, i32 -> vector<4x256xf32>
    %cst_11 = arith.constant 0.000000e+00 : f32
    %36 = vector.broadcast %cst_11 : f32 to vector<4x256xf32>
    %37 = arith.select %9, %35, %36 : vector<4x256xi1>, vector<4x256xf32>
    %c239_i32 = arith.constant 239 : i32
    %38 = tpu.dynamic_rotate %0 by %c239_i32 dim 1 : vector<4x256xf32>, i32 -> vector<4x256xf32>
    %39 = arith.andi %9, %13 : vector<4x256xi1>
    %cst_12 = arith.constant 0.000000e+00 : f32
    %40 = vector.broadcast %cst_12 : f32 to vector<4x256xf32>
    %41 = arith.select %39, %38, %40 : vector<4x256xi1>, vector<4x256xf32>
    %42 = tpu.concatenate %17, %20, %24, %27, %0, %30, %34, %37, %41 in 0 : vector<4x256xf32>, vector<4x256xf32>, vector<4x256xf32>, vector<4x256xf32>, vector<4x256xf32>, vector<4x256xf32>, vector<4x256xf32>, vector<4x256xf32>, vector<4x256xf32> -> vector<36x256xf32>
    %c0_13 = arith.constant 0 : index
    %c0_14 = arith.constant 0 : index
    %43 = vector.load %arg2[%c0_13, %c0_14] : memref<48x128xf32, #tpu.memory_space<vmem>>, vector<32x36xf32>
    %c0_15 = arith.constant 0 : index
    %c40 = arith.constant 40 : index
    %44 = vector.load %arg2[%c0_15, %c40] : memref<48x128xf32, #tpu.memory_space<vmem>>, vector<32x1xf32>
    %45 = arith.truncf %43 : vector<32x36xf32> to vector<32x36xbf16>
    %46 = arith.truncf %42 : vector<36x256xf32> to vector<36x256xbf16>
    %cst_16 = arith.constant dense<0.000000e+00> : vector<32x256xf32>
    %47 = tpu.matmul %45, %46, %cst_16 {dimension_numbers = #tpu.dot_dimension_numbers<[1], [0], [0], [1], [0, 0, 1, 1], [], []>} : vector<32x36xbf16>, vector<36x256xbf16>, vector<32x256xf32> -> vector<32x256xf32>
    %48 = vector.broadcast %44 : vector<32x1xf32> to vector<32x256xf32>
    %49 = arith.addf %47, %48 : vector<32x256xf32>
    %cst_17 = arith.constant 0.000000e+00 : f32
    %50 = vector.broadcast %cst_17 : f32 to vector<32x256xf32>
    %51 = arith.maximumf %49, %50 : vector<32x256xf32>
    %cst_18 = arith.constant dense<0.000000e+00> : vector<32xf32>
    %52 = vector.multi_reduction <add>, %51, %cst_18 [1] : vector<32x256xf32> to vector<32xf32>
    %53 = vector.shape_cast %52 : vector<32xf32> to vector<32x1xf32>
    %c0_19 = arith.constant 0 : index
    %c0_20 = arith.constant 0 : index
    %54 = vector.load %arg1[%c0_19, %c0_20] : memref<8x1xf32, #tpu.memory_space<vmem>>, vector<8x1xf32>
    %55 = tpu.concatenate %53, %54 in 0 : vector<32x1xf32>, vector<8x1xf32> -> vector<40x1xf32>
    %c0_21 = arith.constant 0 : index
    %c64 = arith.constant 64 : index
    %56 = vector.load %arg2[%c0_21, %c64] : memref<48x128xf32, #tpu.memory_space<vmem>>, vector<40x5xf32>
    %c40_22 = arith.constant 40 : index
    %c64_23 = arith.constant 64 : index
    %57 = vector.load %arg2[%c40_22, %c64_23] : memref<48x128xf32, #tpu.memory_space<vmem>>, vector<1x5xf32>
    %58 = vector.broadcast %55 : vector<40x1xf32> to vector<40x5xf32>
    %59 = arith.mulf %58, %56 : vector<40x5xf32>
    %cst_24 = arith.constant dense<0.000000e+00> : vector<5xf32>
    %60 = vector.multi_reduction <add>, %59, %cst_24 [0] : vector<40x5xf32> to vector<5xf32>
    %61 = vector.shape_cast %60 : vector<5xf32> to vector<1x5xf32>
    %62 = arith.addf %61, %57 : vector<1x5xf32>
    %c0_25 = arith.constant 0 : index
    %c0_26 = arith.constant 0 : index
    %63 = vector.load %arg3[%c0_25, %c0_26] : memref<1x5xf32, #tpu.memory_space<vmem>>, vector<1x5xf32>
    tpu.vector_store %arg3[%c0_25, %c0_26], %62 {strides = array<i32>} : memref<1x5xf32, #tpu.memory_space<vmem>>, vector<1x5xf32>,
    return
  }
}

</mosaic_0001>

<bundles_post_ra>
// kernel: multi_image_forward.1
= control target key start
LH: loop header
LB: loop body
LE: loop exit
PB: predicated region body
PF: predicated region fallthrough
CT: control target
= control target key end

     0   :  { %s684_s0 = inlined_call_operand.vmem [shape: f32[4,256], index: 0, kind: input, shape index: {}]   ;;  %s685_s1 = inlined_call_operand.vmem [shape: f32[8,1], index: 1, kind: input, shape index: {}]   ;;  %s686_s2 = inlined_call_operand.vmem [shape: f32[48,128], index: 2, kind: input, shape index: {}]   ;;  %s687_s3 = inlined_call_operand.hbm [shape: f32[1,5], index: 3, kind: output, shape index: {}]  }
   0x1   :  { %v464_v0 = vld [vmem:[%s684_s0] sm:$0xff] }
   0x2   :  { %8 = vsyncpa [#allocation3], 0  ;;  %v468_v1 = vcombine.high %v464_v0, %v464_v0  ;;  %s429_s14 = smov 112   ;;  %s430_s15 = smov 111   ;;  %v435_v3 = vmov 0   ;;  %v438_v4 = vmov 40   ;;  %v17_v9 = vlaneseq }
   0x3   :  { %s431_s16 = smov 113   ;;  %s432_s17 = smov 127   ;;  %226 = vmatprep.mubr.bf16.mxu0 %v435_v3  ;;  %236 = vmatprep.mubr.bf16.mxu1 %v435_v3  ;;  %v475_v5 = vld [vmem:[%s686_s2] sm:$0xff]  ;;  %v480_v6 = vld [vmem:[%s686_s2 + $0x8] sm:$0xff]  ;;  %v487_v7 = vld [vmem:[%s686_s2 + $0x10] sm:$0xff]  ;;  %vm187_vm5 = vcmask 1041408  }
   0x4   :  { %v372_v2 = vpack.i.bf16 %v468_v1, %v464_v0  ;;  %s433_s18 = smov 1   ;;  %s434_s0 = smov 16   ;;  %402 = vset.pattern.permute.xlu0 %v438_v4  ;;  %403 = vset.pattern.permute.xlu1 %v438_v4  ;;  %v492_v8 = vld [vmem:[%s686_s2 + $0x18] sm:$0xff]  ;;  %v496_v10 = vand.u32 127, %v17_v9  ;;  %v152_v35 = vpack.c.bf16 %v480_v6, %v475_v5 }
   0x5   :  { %s436_s19 = smov 15   ;;  %s437_s20 = smov 17   ;;  %v153_v26 = vpack.c.bf16 %v492_v8, %v487_v7 }
   0x6   :  { %373 = vrot.lane.b32.xlu1 %v372_v2, %s429_s14  ;;  %363 = vrot.lane.b32.xlu0 %v372_v2, %s430_s15  ;;  %v19_v11 = vadd.s32 128, %v496_v10  ;;  %v22_v12 = vand.u32 15, %v496_v10  ;;  %v20_v13 = vshra.s32 %v496_v10, 4  ;;  %vm99_vm4 = vcmp.lt.s32.totalorder %v496_v10, 112  ;;  %s439_s7 = smov 64   ;;  %s440_s8 = smov [#allocation2]  }
   0x7   :  { %vm88_vm6 = vcmp.lt.s32.totalorder %v496_v10, 113  ;;  %vm79_vm7 = vcmp.lt.s32.totalorder %v496_v10, 127  ;;  %vm108_vm8 = vcmp.lt.s32.totalorder %v496_v10, 111  ;;  %vm50_vm11 = vcmp.lt.s32.totalorder %v496_v10, 16  ;;  %s333_s9 = sshll.u32 %s440_s8, 4  ;;  %s334_s9 = int_to_ptr.vmem [resolvable:$true] %s333_s9 }
   0x8   :  { %v21_v14 = vshra.s32 %v19_v11, 4  ;;  %v23_v15 = vand.u32 15, %v19_v11  ;;  %vm501_vm0 = vcmp.lt.s32.totalorder %v20_v13, 15  ;;  %vm505_vm1 = vcmp.lt.s32.totalorder %v22_v12, 15  ;;  %s407_s10 = scalar_lea.vmem %s334_s9, 16  ;;  %s411_s11 = scalar_lea.vmem %s334_s9, 32 }
   0x9   :  { %vm111_vm10 = vmand %vm501_vm0, %vm505_vm1  ;;  %vm534_vm14 = vcmp.ge.s32.totalorder %v22_v12, 1  ;;  %vm538_vm15 = vcmp.ge.s32.totalorder %v20_v13, 1  ;;  %p408_p0 = scmp.ne.s32.totalorder %s334_s9, %s407_s10  ;;  %p412_p1 = scmp.lt.s32.totalorder %s334_s9, %s334_s9 }
   0xa   :  { %378 = vrot.lane.b32.xlu1 %v372_v2, %s431_s16  ;;  %368 = vrot.lane.b32.xlu0 %v372_v2, %s432_s17  ;;  %vm509_vm2 = vcmp.lt.s32.totalorder %v21_v14, 15  ;;  %vm513_vm3 = vcmp.lt.s32.totalorder %v23_v15, 15  ;;  %vm530_vm13 = vcmp.ge.s32.totalorder %v23_v15, 1  ;;  %vm551_vm9 = vcmp.ge.s32.totalorder %v21_v14, 1  ;;  %p413_p2 = scmp.lt.s32.totalorder %s411_s11, %s407_s10 }
   0xb   :  { %vm112_vm12 = vmand %vm509_vm2, %vm513_vm3 }
   0xc   :  { %p414_p3 = por %p413_p2, %p412_p1 }
   0xe   :  { %388 = vrot.lane.b32.xlu1 %v372_v2, %s433_s18  ;;  %383 = vrot.lane.b32.xlu0 %v372_v2, %s434_s0  ;;  %p415_p4 = pnand %p414_p3, %p408_p0 }
  0x12   :  { %398 = vrot.lane.b32.xlu1 %v372_v2, %s436_s19  ;;  %393 = vrot.lane.b32.xlu0 %v372_v2, %s437_s20 }
  0x16   :  { %162 = vperm.xlu0 %402, %v475_v5   ;;  %167 = vperm.xlu1 %403, %v480_v6  }
  0x1a   :  { %172 = vperm.xlu1 %403, %v487_v7   ;;  %177 = vperm.xlu0 %402, %v492_v8  }
  0x1e   :  { %404 = vset.pattern.permute.xlu0 %v435_v3  ;;  %405 = vset.pattern.permute.xlu1 %v435_v3 }
  0x78   :  { %v374_v20 = vpop.permute.xlu1 %373  ;;  %v364_v21 = vpop.permute.xlu0 %363 }
  0x79   :  { %v376_v22 = vunpack.i.h.bf16 %v374_v20  ;;  %v375_v23 = vunpack.i.l.bf16 %v374_v20  ;;  %v366_v24 = vunpack.i.h.bf16 %v364_v21  ;;  %v365_v25 = vunpack.i.l.bf16 %v364_v21 }
  0x7b   :  { %v100_v29 = vsel %vm99_vm4, %v375_v23, %v376_v22  ;;  %v101_v30 = vsel %vm99_vm4, %v376_v22, %v375_v23  ;;  %v110_v31 = vsel %vm108_vm8, %v366_v24, %v365_v25  ;;  %v109_v32 = vsel %vm108_vm8, %v365_v25, %v366_v24  ;;  %vm92_vm4 = vmand %vm509_vm2, %vm530_vm13 }
  0x7c   :  { %v379_v33 = vpop.permute.xlu1 %378  ;;  %v369_v34 = vpop.permute.xlu0 %368  ;;  %v103_v36 = vsel %vm509_vm2, %v101_v30, 0.0  ;;  %v114_v37 = vsel %vm112_vm12, %v110_v31, 0.0  ;;  %v113_v38 = vsel %vm111_vm10, %v109_v32, 0.0  ;;  %vm59_vm8 = vcmp.lt.s32.totalorder %v496_v10, 15  ;;  %vm91_vm10 = vmand %vm501_vm0, %vm534_vm14 }
  0x7d   :  { %v381_v39 = vunpack.i.h.bf16 %v379_v33  ;;  %v380_v40 = vunpack.i.l.bf16 %v379_v33  ;;  %v371_v41 = vunpack.i.h.bf16 %v369_v34  ;;  %v370_v42 = vunpack.i.l.bf16 %v369_v34 }
  0x7e   :  { %v136_v43 = vrot.slane %v103_v36, 4  ;;  %v159_v44 = vpack.c.bf16 %v114_v37, %v114_v37  ;;  %v102_v45 = vsel %vm501_vm0, %v100_v29, 0.0  ;;  %v158_v46 = vpack.c.bf16 %v113_v38, %v113_v38 }
  0x7f   :  { %vm39_vm12 = vcmp.lt.s32.totalorder %v496_v10, 17  ;;  %v89_v47 = vsel %vm88_vm6, %v380_v40, %v381_v39  ;;  %v90_v48 = vsel %vm88_vm6, %v381_v39, %v380_v40  ;;  %v80_v49 = vsel %vm79_vm7, %v370_v42, %v371_v41 }
  0x80   :  { %v81_v50 = vsel %vm79_vm7, %v371_v41, %v370_v42  ;;  %341 = vmatprep.subr.msk.bf16.mxu0 %vm187_vm5, %v159_v44  ;;  %344 = vmatprep.subr.msk.bf16.mxu1 %vm187_vm5, %v159_v44  ;;  %v389_v52 = vpop.permute.xlu1 %388  ;;  %v384_v53 = vpop.permute.xlu0 %383  ;;  %v82_v54 = vsel %vm505_vm1, %v80_v49, 0.0  ;;  %v189_v55 = vsel %vm187_vm5, %v158_v46, 0  ;;  %v94_v56 = vsel %vm92_vm4, %v90_v48, 0.0  ;;  %vm63_vm4 = vmand %vm551_vm9, %vm513_vm3 }
  0x81   :  { %v83_v51 = vsel %vm513_vm3, %v81_v50, 0.0  ;;  %v391_v58 = vunpack.i.h.bf16 %v389_v52  ;;  %v390_v59 = vunpack.i.l.bf16 %v389_v52  ;;  %v386_v60 = vunpack.i.h.bf16 %v384_v53  ;;  %205 = vmatpush1.bf16.msra.mxu0 %v189_v55  ;;  %347 = vmatpush1.bf16.msra.mxu1 %v189_v55 }
  0x82   :  { %v130_v57 = vrot.slane %v83_v51, 4  ;;  %v385_v61 = vunpack.i.l.bf16 %v384_v53  ;;  %v129_v62 = vrot.slane %v82_v54, 4  ;;  %v135_v63 = vrot.slane %v102_v45, 4 }
  0x83   :  { %v93_v2 = vsel %vm91_vm10, %v89_v47, 0.0  ;;  %vm704_vm5 = vcmp.lt.s32.totalorder %v496_v10, 1  ;;  %vm706_vm6 = vcmask 1043456   ;;  %vm43_vm10 = vmand %vm551_vm9, %vm530_vm13  ;;  %vm180_vm3 = vcmask 293888  }
  0x84   :  { %v71_v3 = vsel %vm704_vm5, %v390_v59, %v391_v58  ;;  %vm705_vm2 = vmmov %vm704_vm5  ;;  %v145_v9 = vsel %vm706_vm6, %v468_v1, %v130_v57  ;;  %v51_v14 = vsel %vm50_vm11, %v385_v61, %v386_v60  ;;  %v52_v15 = vsel %vm50_vm11, %v386_v60, %v385_v61  ;;  %v399_v1 = vpop.permute.xlu1 %398  ;;  %v394_v16 = vpop.permute.xlu0 %393 }
  0x85   :  { %v72_v4 = vsel %vm705_vm2, %v391_v58, %v390_v59  ;;  %vm707_vm7 = vmmov %vm706_vm6  ;;  %v74_v13 = vsel %vm530_vm13, %v71_v3, 0.0  ;;  %v53_v20 = vsel %vm538_vm15, %v52_v15, 0.0  ;;  %v54_v21 = vsel %vm551_vm9, %v51_v14, 0.0 }
  0x86   :  { %v147_v11 = vsel %vm707_vm7, %v94_v56, %v136_v43  ;;  %v73_v12 = vsel %vm534_vm14, %v72_v4, 0.0  ;;  %vm708_vm0 = vmmov %vm706_vm6  ;;  %v124_v23 = vrot.slane %v74_v13, 4  ;;  %v117_v24 = vrot.slane %v53_v20, 4 }
  0x87   :  { %v123_v18 = vrot.slane %v73_v12, 4  ;;  %v146_v22 = vsel %vm708_vm0, %v93_v2, %v135_v63  ;;  %v401_v25 = vunpack.i.h.bf16 %v399_v1  ;;  %v400_v29 = vunpack.i.l.bf16 %v399_v1  ;;  %vm62_vm11 = vmand %vm538_vm15, %vm505_vm1 }
  0x88   :  { %v396_v30 = vunpack.i.h.bf16 %v394_v16  ;;  %v395_v31 = vunpack.i.l.bf16 %v394_v16  ;;  %v157_v32 = vpack.c.bf16 %v147_v11, %v145_v9  ;;  %vm709_vm5 = vmmov %vm708_vm0  ;;  %v118_v34 = vrot.slane %v54_v21, 4 }
  0x89   :  { %v144_v33 = vsel %vm709_vm5, %v464_v0, %v129_v62  ;;  %vm42_vm2 = vmand %vm538_vm15, %vm534_vm14  ;;  %v60_v36 = vsel %vm59_vm8, %v400_v29, %v401_v25  ;;  %v61_v17 = vsel %vm59_vm8, %v401_v25, %v400_v29  ;;  %v267_v25 = vld [vmem:[%s685_s1] sm:$0xff]  ;;  %vm304_vm9 = vcmask 564736  }
  0x8a   :  { %v156_v37 = vpack.c.bf16 %v146_v22, %v144_v33  ;;  %v40_v38 = vsel %vm39_vm12, %v395_v31, %v396_v30  ;;  %v41_v39 = vsel %vm39_vm12, %v396_v30, %v395_v31  ;;  %206 = vmatprep.subr.bf16.mxu0 %v157_v32  ;;  %345 = vmatprep.subr.bf16.mxu1 %v157_v32  ;;  %v65_v0 = vsel %vm63_vm4, %v60_v36, 0.0  ;;  %vm710_vm1 = vmmov %vm708_vm0 }
  0x8b   :  { %v64_v27 = vsel %vm62_vm11, %v61_v17, 0.0  ;;  %v45_v28 = vsel %vm43_vm10, %v40_v38, 0.0  ;;  %v143_v10 = vsel %vm710_vm1, %v65_v0, %v124_v23  ;;  %v44_v40 = vsel %vm42_vm2, %v41_v39, 0.0  ;;  %vm711_vm14 = vmmov %vm708_vm0 }
  0x8c   :  { %207 = vmatpush1.bf16.msra.mxu0 %v156_v37  ;;  %348 = vmatpush1.bf16.msra.mxu1 %v156_v37  ;;  %v142_v41 = vsel %vm711_vm14, %v64_v27, %v123_v18  ;;  %vm712_vm15 = vmmov %vm708_vm0  ;;  %vm325_vm13 = vcmask 32768  }
  0x8d   :  { %v141_v42 = vsel %vm712_vm15, %v45_v28, %v118_v34  ;;  %vm713_vm8 = vmmov %vm708_vm0 }
  0x8e   :  { %v140_v19 = vsel %vm713_vm8, %v44_v40, %v117_v24  ;;  %v155_v43 = vpack.c.bf16 %v143_v10, %v141_v42 }
  0x8f   :  { %v154_v44 = vpack.c.bf16 %v142_v41, %v140_v19 }
  0x90   :  { %208 = vmatprep.subr.bf16.mxu0 %v155_v43  ;;  %346 = vmatprep.subr.bf16.mxu1 %v155_v43 }
  0x91   :  { %209 = vmatpush1.bf16.msra.mxu0 %v154_v44  ;;  %349 = vmatpush1.bf16.msra.mxu1 %v154_v44  ;;  %v163_v45 = vpop.permute.xlu0 %162  ;;  %v168_v46 = vpop.permute.xlu1 %167 }
  0x94   :  { %342 = vmatmul.mubr.msk.bf16.vlgmr.msra.gmra.mxu0 %vm180_vm3, %v152_v35  ;;  %343 = vmatmul.mubr.msk.bf16.vlgmr.msra.gmra.mxu1 %vm180_vm3, %v153_v26 }
  0x95   :  { %v178_v49 = vpop.permute.xlu0 %177  ;;  %v173_v54 = vpop.permute.xlu1 %172 }
 0x154   :  { %v228_v47 = vpop.f32.mrf.mxu0  ;;  %v238_v48 = vpop.f32.mrf.mxu1 }
 0x155   :  { %v229_v50 = vadd.f32 %v228_v47, %v163_v45  ;;  %v239_v61 = vadd.f32 %v238_v48, %v173_v54 }
 0x156   :  { %v230_v51 = vpop.f32.mrf.mxu0  ;;  %v240_v52 = vpop.f32.mrf.mxu1 }
 0x157   :  { %v231_v53 = vadd.f32 %v230_v51, %v163_v45  ;;  %v247_v60 = vmax.f32 %v229_v50, 0.0  ;;  %v241_v2 = vadd.f32 %v240_v52, %v173_v54  ;;  %v251_v15 = vmax.f32 %v239_v61, 0.0 }
 0x158   :  { %v232_v55 = vpop.f32.mrf.mxu0  ;;  %v242_v56 = vpop.f32.mrf.mxu1 }
 0x159   :  { %v248_v57 = vmax.f32 %v231_v53, 0.0  ;;  %v233_v58 = vadd.f32 %v232_v55, %v168_v46  ;;  %v243_v59 = vadd.f32 %v242_v56, %v178_v49  ;;  %v252_v1 = vmax.f32 %v241_v2, 0.0 }
 0x15a   :  { %v234_v62 = vpop.f32.mrf.mxu0  ;;  %v244_v63 = vpop.f32.mrf.mxu1 }
 0x15b   :  { %v235_v3 = vadd.f32 %v234_v62, %v168_v46  ;;  %v253_v4 = vmax.f32 %v243_v59, 0.0  ;;  %v245_v9 = vadd.f32 %v244_v63, %v178_v49  ;;  %v255_v11 = vadd.f32 %v248_v57, %v247_v60 }
 0x15c   :  { %v249_v12 = vmax.f32 %v233_v58, 0.0  ;;  %v261_v20 = vadd.f32 %v252_v1, %v251_v15 }
 0x15d   :  { %v250_v13 = vmax.f32 %v235_v3, 0.0  ;;  %v254_v14 = vmax.f32 %v245_v9, 0.0  ;;  %256 = vadd.xlane.f32.xlu1 %v255_v11 }
 0x15f   :  { %v258_v16 = vadd.f32 %v250_v13, %v249_v12  ;;  %v264_v18 = vadd.f32 %v254_v14, %v253_v4 }
 0x161   :  { %259 = vadd.xlane.f32.xlu0 %v258_v16  ;;  %265 = vadd.xlane.f32.xlu1 %v264_v18 }
 0x165   :  { %262 = vadd.xlane.f32.xlu0 %v261_v20 }
 0x1e6   :  { %v257_v21 = vpop.xlane.xlu1 %256 }
 0x1e7   :  { %276 = vperm.xlu0 %404, %v257_v21  }
 0x1ea   :  { %v260_v22 = vpop.xlane.xlu0 %259  ;;  %v266_v24 = vpop.xlane.xlu1 %265 }
 0x1ee   :  { %v263_v23 = vpop.xlane.xlu0 %262 }
 0x1ef   :  { %286 = vperm.xlu1 %405, %v263_v23  }
 0x1f3   :  { %281 = vperm.xlu1 %405, %v260_v22  }
 0x1f7   :  { %291 = vperm.xlu1 %405, %v266_v24  }
 0x1fb   :  { %296 = vperm.xlu1 %405, %v267_v25  }
 0x262   :  { %v277_v29 = vpop.permute.xlu0 %276 }
 0x263   :  { %v299_v31 = vmul.f32 %v277_v29, %v475_v5  ;;  %v272_v5 = vld [vmem:[%s686_s2 + $0x20] sm:$0xff] }
 0x265   :  { %v305_v36 = vsel %vm304_vm9, %v299_v31, 0.0 }
 0x26a   :  { %v287_v30 = vpop.permute.xlu1 %286 }
 0x26b   :  { %v301_v33 = vmul.f32 %v287_v30, %v487_v7 }
 0x26d   :  { %v308_v39 = vsel %vm304_vm9, %v301_v33, 0.0 }
 0x26e   :  { %v282_v32 = vpop.permute.xlu1 %281 }
 0x26f   :  { %v300_v34 = vmul.f32 %v282_v32, %v480_v6 }
 0x271   :  { %v306_v17 = vsel %vm304_vm9, %v300_v34, 0.0 }
 0x272   :  { %v307_v37 = vadd.f32 %v306_v17, %v305_v36  ;;  %v292_v38 = vpop.permute.xlu1 %291 }
 0x273   :  { %v302_v0 = vmul.f32 %v292_v38, %v492_v8  ;;  %v273_v8 = vld [vmem:[%s686_s2 + $0x28] sm:$0x1] }
 0x274   :  { %v309_v27 = vadd.f32 %v308_v39, %v307_v37 }
 0x275   :  { %v310_v28 = vsel %vm304_vm9, %v302_v0, 0.0 }
 0x276   :  { %v297_v7 = vpop.permute.xlu1 %296  ;;  %v311_v6 = vadd.f32 %v310_v28, %v309_v27 }
 0x277   :  { %v303_v10 = vmul.f32 %v297_v7, %v272_v5 }
 0x279   :  { %v312_v40 = vsel %vm304_vm9, %v303_v10, 0.0 }
 0x27a   :  { %v313_v41 = vadd.f32 %v312_v40, %v311_v6 }
 0x27c   :  { %v314_v42 = vrot.slane %v313_v41, 4 }
 0x27e   :  { %v315_v19 = vadd.f32 %v314_v42, %v313_v41 }
 0x280   :  { %v316_v43 = vrot.slane %v315_v19, 2 }
 0x282   :  { %v317_v44 = vadd.f32 %v316_v43, %v315_v19 }
 0x284   :  { %v318_v35 = vrot.slane %v317_v44, 1 }
 0x286   :  { %v319_v26 = vadd.f32 %v318_v35, %v317_v44 }
 0x288   :  { %v320_v45 = vadd.f32 %v319_v26, %v273_v8 }
 0x28a   :  { %322 = vrot.lane.b32.xlu1 %v320_v45, %s439_s7 }
 0x2fc   :  { %v323_v46 = vpop.permute.xlu1 %322 }
 0x2fd   :  { %326 = vst.msk [vmem:[#allocation2] sm:$0x1] %vm325_vm13, %v323_v46 }
 0x2fe   :  { %418 = shalt.err (!%p415_p4)
}
 0x2ff   :  { %336 = dma.vmem_to_hbm [thread:$0]  %s334_s9, 16, %s687_s3, [#allocation3]  }
 0x300   :  { %427 = dma.done.wait [#allocation3], 16  }
 0x301   :  { %428 = vsyncadd [#allocation3], 4294967280 }
 0x302   :  { %340 = vsyncpa [#allocation3], 1 }

</bundles_post_ra>
